<compile_context>
chip_gen: v7x
topology: tpu7x:2x2x1
jax: 0.10.0
libtpu: 0.0.40
codegen_flags: <defaults>
</compile_context>

<pallas_src>
import jax
import jax.numpy as jnp
from jax.experimental import pallas as pl
from jax.experimental.pallas import tpu as pltpu


# sublane packing per element byte-width: f32 -> 8, bf16 -> 16, int8/fp8 -> 32
_SUBLANE = {4: 8, 2: 16, 1: 32}


def _l2ball_kernel(r_ref, x_ref, o_ref):
    """Project each row of the (tile_m, N) tile onto the L2 ball of radius r.

    r_ref : (1,) float32 in SMEM (runtime radius)
    x_ref : (tile_m, N) input tile in VMEM
    o_ref : (tile_m, N) output tile in VMEM
    """
    r = r_ref[0]
    x = x_ref[...]
    xf = x.astype(jnp.float32)
    # Row-wise squared norm; compare against r^2 so no sqrt on the critical path.
    ssq = jnp.sum(xf * xf, axis=-1, keepdims=True)            # (tile_m, 1) f32
    # rsqrt goes to the EUP slot (free on a mem-bound kernel). Rows with
    # ssq == 0 evaluate rsqrt(0)=inf but the where() never selects it.
    scale = jnp.where(ssq > r * r, r * jax.lax.rsqrt(ssq), jnp.float32(1.0))
    if o_ref.dtype == jnp.float32:
        o_ref[...] = xf * scale
    else:
        # Keep the full-tile multiply in the native dtype (bf16 VPU on v6e/v7x)
        # so no f32 copy of the whole tile is materialized for the store.
        o_ref[...] = (x * scale.astype(x.dtype)).astype(o_ref.dtype)


def _device_hints():
    try:
        kind = jax.devices()[0].device_kind.lower()
    except Exception:
        kind = ""
    is_v7x = "v7" in kind
    is_v5e = ("v5 lite" in kind) or ("v5e" in kind) or ("v5lite" in kind)
    return is_v7x, is_v5e


def _pick_tile_m(B, N, itemsize, is_v7x, is_v5e):
    sublane = _SUBLANE.get(itemsize, 8)
    # True resident VMEM working set per step: double-buffered input + output
    # tiles in the native dtype plus ~one f32 temp tile for the compute.
    bytes_per_row = N * (4 * itemsize + 4)
    # Per-generation resident budgets (headroom under the scoped-VMEM limits:
    # v5e 16 MiB default scoped / 128 physical, v6e 32/128, v7x 32/64).
    if is_v5e:
        budget = 10 * 1024 * 1024
    elif is_v7x:
        budget = 20 * 1024 * 1024
    else:
        budget = 24 * 1024 * 1024
    tile_m = budget // max(bytes_per_row, 1)
    tile_m = max(sublane, min(1024, (tile_m // sublane) * sublane))
    # Never larger than the sublane-rounded batch.
    tile_m = min(tile_m, pl.cdiv(B, sublane) * sublane)
    # v7x: two TensorCores share the ("parallel",) grid axis -> make sure each
    # core gets >= 2 pipelined steps when the batch is big enough; never drop
    # below the ~256-row HBM-bandwidth plateau.  Single-TC chips (v5e/v6e)
    # keep the large tile: splitting there only adds per-step overhead.
    if is_v7x:
        while pl.cdiv(B, tile_m) < 4 and tile_m // 2 >= max(256, sublane):
            tile_m = (tile_m // 2 // sublane) * sublane
    return tile_m, sublane


def euclidean_projection_l2ball(x, radius=1.0, *, tile_m=None):
    """Forward pass of EuclideanProjection with the L2-ball method: rows with
    ||x||_2 > radius are rescaled onto the sphere, rows inside pass through."""
    orig_shape = x.shape
    if x.ndim == 1:
        x2 = x[None, :]
    elif x.ndim == 2:
        x2 = x
    else:
        x2 = x.reshape((-1, x.shape[-1]))
    B, N = x2.shape
    itemsize = jnp.dtype(x2.dtype).itemsize

    is_v7x, is_v5e = _device_hints()
    if tile_m is None:
        tile_m, _ = _pick_tile_m(B, N, itemsize, is_v7x, is_v5e)
    else:
        sublane = _SUBLANE.get(itemsize, 8)
        tile_m = max(sublane, (int(tile_m) // sublane) * sublane)

    num_tiles = pl.cdiv(B, tile_m)

    # Explicit scoped-VMEM limit matching the true resident working set
    # (2x in + 2x out native-dtype tiles + one f32 temp tile) plus headroom.
    resident = tile_m * N * (4 * itemsize + 4)
    vmem_limit = resident + max(resident // 2, 4 * 1024 * 1024)
    vmem_cap = (48 if is_v7x else 100) * 1024 * 1024
    vmem_limit = int(min(max(vmem_limit, 16 * 1024 * 1024), vmem_cap))

    radius_arr = jnp.asarray(radius, dtype=jnp.float32).reshape((1,))

    # TODO(synk): for tiny feature dims (N < 128) a lane-dense repack of the
    # output (fold rows into one 128-lane row) would avoid masked vst stores.
    out = pl.pallas_call(
        _l2ball_kernel,
        out_shape=jax.ShapeDtypeStruct((B, N), x2.dtype),
        grid_spec=pltpu.PrefetchScalarGridSpec(
            num_scalar_prefetch=0,
            grid=(num_tiles,),
            in_specs=[
                # runtime radius scalar in SMEM (no recompile per value)
                pl.BlockSpec(memory_space=pltpu.MemorySpace.SMEM),
                # row tile; ragged last tile handled by Pallas partial blocks
                pl.BlockSpec((tile_m, N), lambda i: (i, 0)),
            ],
            out_specs=pl.BlockSpec((tile_m, N), lambda i: (i, 0)),
        ),
        compiler_params=pltpu.CompilerParams(
            dimension_semantics=("parallel",),
            vmem_limit_bytes=vmem_limit,
        ),
    )(radius_arr, x2)

    return out.reshape(orig_shape)


def _reference(x, radius):
    norm = jnp.linalg.norm(x, axis=-1, keepdims=True)
    return jnp.where(norm > radius, radius * x / norm, x)


if __name__ == "__main__":
    key = jax.random.PRNGKey(0)
    B, N = 16, 256
    # scale so some rows lie outside the unit ball and some inside
    x = jax.random.normal(key, (B, N), dtype=jnp.float32) * 0.08
    radius = 1.0

    out = jax.block_until_ready(euclidean_projection_l2ball(x, radius))
    ref = _reference(x, radius)
    assert out.shape == x.shape and out.dtype == x.dtype
    assert jnp.allclose(out, ref, atol=1e-5, rtol=1e-5)

    # ragged batch exercises the partial-last-block path (no pad / no slice)
    x2 = jax.random.normal(jax.random.PRNGKey(1), (11, N), jnp.float32) * 0.08
    out2 = jax.block_until_ready(euclidean_projection_l2ball(x2, radius))
    assert jnp.allclose(out2, _reference(x2, radius), atol=1e-5, rtol=1e-5)

    # different runtime radius reuses the same compiled kernel (SMEM scalar)
    out3 = jax.block_until_ready(euclidean_projection_l2ball(x2, 0.5))
    assert jnp.allclose(out3, _reference(x2, 0.5), atol=1e-5, rtol=1e-5)

    print("KERNEL_OK")
</pallas_src>

<mosaic_0001>
module attributes {stable_mosaic.version = 11 : i64} {
  func.func @_l2ball_kernel(%arg0: i32, %arg1: memref<1xf32, #tpu.memory_space<smem>>, %arg2: memref<16x256xf32, #tpu.memory_space<vmem>>, %arg3: memref<16x256xf32, #tpu.memory_space<vmem>>) attributes {dimension_semantics = [#tpu.dimension_semantics<parallel>], iteration_bounds = array<i64: 1>, scalar_prefetch = 0 : i64, scratch_operands = 0 : i64, tpu.core_type = #tpu.core_type<tc>, window_params = [{transform_indices = @transform_0, window_bounds = array<i64: 1>}, {transform_indices = @transform_1, window_bounds = array<i64: 16, 256>}, {transform_indices = @transform_2, window_bounds = array<i64: 16, 256>}]} {
    %c0 = arith.constant 0 : index
    %0 = memref.load %arg1[%c0] : memref<1xf32, #tpu.memory_space<smem>>
    %c0_0 = arith.constant 0 : index
    %c0_1 = arith.constant 0 : index
    %1 = vector.load %arg2[%c0_0, %c0_1] : memref<16x256xf32, #tpu.memory_space<vmem>>, vector<16x256xf32>
    %2 = arith.mulf %1, %1 : vector<16x256xf32>
    %cst = arith.constant dense<0.000000e+00> : vector<16xf32>
    %3 = vector.multi_reduction <add>, %2, %cst [1] : vector<16x256xf32> to vector<16xf32>
    %4 = vector.shape_cast %3 : vector<16xf32> to vector<16x1xf32>
    %5 = arith.mulf %0, %0 : f32
    %6 = vector.broadcast %5 : f32 to vector<16x1xf32>
    %7 = arith.cmpf ogt, %4, %6 : vector<16x1xf32>
    %8 = math.rsqrt %4 : vector<16x1xf32>
    %9 = vector.broadcast %0 : f32 to vector<16x1xf32>
    %10 = arith.mulf %9, %8 : vector<16x1xf32>
    %cst_2 = arith.constant 1.000000e+00 : f32
    %11 = vector.broadcast %cst_2 : f32 to vector<16x1xf32>
    %12 = arith.select %7, %10, %11 : vector<16x1xi1>, vector<16x1xf32>
    %13 = vector.broadcast %12 : vector<16x1xf32> to vector<16x256xf32>
    %14 = arith.mulf %1, %13 : vector<16x256xf32>
    %c0_3 = arith.constant 0 : index
    %c0_4 = arith.constant 0 : index
    %15 = vector.load %arg3[%c0_3, %c0_4] : memref<16x256xf32, #tpu.memory_space<vmem>>, vector<16x256xf32>
    tpu.vector_store %arg3[%c0_3, %c0_4], %14 {strides = array<i32>} : memref<16x256xf32, #tpu.memory_space<vmem>>, vector<16x256xf32>,
    return
  }
  func.func @transform_0(%arg0: i32) -> i32 {
    %c0_i32 = arith.constant 0 : i32
    %c0_i32_0 = arith.constant 0 : i32
    return %c0_i32 : i32
  }
  func.func @transform_1(%arg0: i32) -> (i32, i32) {
    %c0_i32 = arith.constant 0 : i32
    %c0_i32_0 = arith.constant 0 : i32
    return %arg0, %c0_i32 : i32, i32
  }
  func.func @transform_2(%arg0: i32) -> (i32, i32) {
    %c0_i32 = arith.constant 0 : i32
    %c0_i32_0 = arith.constant 0 : i32
    return %arg0, %c0_i32 : i32, i32
  }
}

</mosaic_0001>

<bundles_post_ra>
// kernel: tpu_custom_call.1
= control target key start
LH: loop header
LB: loop body
LE: loop exit
PB: predicated region body
PF: predicated region fallthrough
CT: control target
= control target key end

     0   :  { %8 = vsyncpa [#allocation4], 0  ;;  %s190_s0 = inlined_call_operand.<no memory space> [shape: f32[1], index: 0, kind: input, shape index: {}]   ;;  %s191_s1 = inlined_call_operand.hbm [shape: f32[16,256], index: 1, kind: input, shape index: {}]   ;;  %s192_s2 = inlined_call_operand.hbm [shape: f32[16,256], index: 2, kind: output, shape index: {}]  }
   0x1   :  { %9 = vsyncpa [#allocation5], 0  ;;  %s134_s9 = smov [#allocation3]   ;;  %s86_s13 = scalar_lea.hbm %s191_s1, 512 }
   0x2   :  { %s17_s10 = sshll.u32 %s134_s9, 4  ;;  %p87_p0 = scmp.ne.s32.totalorder %s191_s1, %s86_s13  ;;  %s18_s10 = int_to_ptr.vmem [resolvable:$true] %s17_s10 }
   0x3   :  { %p90_p1 = scmp.lt.u32.totalorder %s86_s13, %s191_s1 }
   0x5   :  { %p92_p2 = pnand %p90_p1, %p87_p0 }
   0x7   :  { %95 = shalt.err (!%p92_p2)
}
   0x8   :  { %s96_s18 = scalar_lea.vmem %s18_s10, 512  ;;  %p101_p4 = scmp.lt.s32.totalorder %s18_s10, %s18_s10 }
   0x9   :  { %p97_p3 = scmp.ne.s32.totalorder %s18_s10, %s96_s18  ;;  %p102_p5 = scmp.lt.s32.totalorder %s96_s18, %s96_s18 }
   0xb   :  { %p103_p6 = por %p102_p5, %p101_p4 }
   0xd   :  { %p104_p7 = pnand %p103_p6, %p97_p3 }
   0xf   :  { %107 = shalt.err (!%p104_p7)
}
  0x10   :  { %s135_s19 = smov 256   ;;  %s136_s20 = smov 16  }
  0x11   :  { %23 = dma.hbm_to_vmem [thread:$0]  %s191_s1, 512, %s18_s10, [#allocation4], %s135_s19, %s135_s19, %s136_s20  }
  0x12   :  { %130 = dma.done.wait [#allocation4], 512  }
  0x13   :  { %131 = vsyncadd [#allocation4], 4294966784  ;;  %v28_v0 = vld [vmem:[#allocation3] sm:$0xff]  ;;  %v29_v1 = vld [vmem:[#allocation3 + $0x8] sm:$0xff]  ;;  %s42_s24 = smul.f32 %s190_s0, %s190_s0  ;;  %v48_v12 = vstv %s190_s0  ;;  %s137_s27 = smov [#allocation6]  }
  0x14   :  { %v30_v2 = vld [vmem:[#allocation3 + $0x10] sm:$0xff]  ;;  %v32_v3 = vmul.f32 %v28_v0, %v28_v0  ;;  %v33_v4 = vmul.f32 %v29_v1, %v29_v1  ;;  %v31_v5 = vld [vmem:[#allocation3 + $0x18] sm:$0xff]  ;;  %s66_s28 = sshll.u32 %s137_s27, 4  ;;  %s67_s28 = int_to_ptr.vmem [resolvable:$true] %s66_s28 }
  0x15   :  { %v34_v6 = vmul.f32 %v30_v2, %v30_v2  ;;  %v35_v7 = vmul.f32 %v31_v5, %v31_v5  ;;  %v43_v13 = vstv %s42_s24  ;;  %s108_s0 = scalar_lea.vmem %s67_s28, 512  ;;  %p113_p9 = scmp.lt.s32.totalorder %s67_s28, %s67_s28 }
  0x16   :  { %v36_v8 = vadd.f32 %v33_v4, %v32_v3  ;;  %p109_p8 = scmp.ne.s32.totalorder %s67_s28, %s108_s0  ;;  %p114_p10 = scmp.lt.s32.totalorder %s108_s0, %s108_s0 }
  0x17   :  { %v39_v9 = vadd.f32 %v35_v7, %v34_v6 }
  0x18   :  { %37 = vadd.xlane.f32.xlu0 %v36_v8  ;;  %p115_p11 = por %p114_p10, %p113_p9 }
  0x1a   :  { %p116_p12 = pnand %p115_p11, %p109_p8 }
  0x1c   :  { %40 = vadd.xlane.f32.xlu0 %v39_v9 }
  0xa5   :  { %v38_v10 = vpop.xlane.xlu0 %37 }
  0xa6   :  { %82 = vrsqrt.f32 %v38_v10  ;;  %vm44_vm0 = vcmp.gt.f32.partialorder %v38_v10, %v43_v13 }
  0xa9   :  { %v41_v11 = vpop.xlane.xlu0 %40 }
  0xaa   :  { %84 = vrsqrt.f32 %v41_v11  ;;  %vm45_vm1 = vcmp.gt.f32.partialorder %v41_v11, %v43_v13 }
  0xb0   :  { %v83_v14 = vpop.eup %82 }
  0xb1   :  { %v49_v15 = vmul.f32 %v83_v14, %v48_v12 }
  0xb3   :  { %v51_v16 = vsel %vm44_vm0, %v49_v15, 1.0 }
  0xb4   :  { %v85_v17 = vpop.eup %84  ;;  %v53_v18 = vmul.f32 %v51_v16, %v28_v0  ;;  %v54_v19 = vmul.f32 %v51_v16, %v29_v1 }
  0xb5   :  { %v50_v20 = vmul.f32 %v85_v17, %v48_v12 }
  0xb6   :  { %57 = vst [vmem:[#allocation6] sm:$0xff] %v53_v18  ;;  %58 = vst [vmem:[#allocation6 + $0x8] sm:$0xff] %v54_v19 }
  0xb7   :  { %v52_v21 = vsel %vm45_vm1, %v50_v20, 1.0 }
  0xb8   :  { %v55_v22 = vmul.f32 %v52_v21, %v30_v2  ;;  %v56_v23 = vmul.f32 %v52_v21, %v31_v5 }
  0xba   :  { %59 = vst [vmem:[#allocation6 + $0x10] sm:$0xff] %v55_v22  ;;  %60 = vst [vmem:[#allocation6 + $0x18] sm:$0xff] %v56_v23 }
  0xbb   :  { %119 = shalt.err (!%p116_p12)
}
  0xbc   :  { %s120_s3 = scalar_lea.hbm %s192_s2, 512 }
  0xbd   :  { %p121_p13 = scmp.ne.s32.totalorder %s192_s2, %s120_s3  ;;  %p124_p0 = scmp.lt.u32.totalorder %s120_s3, %s192_s2 }
  0xbf   :  { %p126_p1 = pnand %p124_p0, %p121_p13 }
  0xc1   :  { %129 = shalt.err (!%p126_p1)
}
  0xc2   :  { %72 = dma.vmem_to_hbm [thread:$0]  %s67_s28, 512, %s192_s2, [#allocation5], %s135_s19, %s135_s19, %s136_s20  }
  0xc3   :  { %132 = dma.done.wait [#allocation5], 512  }
  0xc4   :  { %133 = vsyncadd [#allocation5], 4294966784 }
  0xc5   :  { %76 = vsyncpa [#allocation4], 1 }
  0xc6   :  { %77 = vsyncpa [#allocation5], 1 }

</bundles_post_ra>
